<compile_context>
chip_gen: v7x
topology: tpu7x:2x2x1
jax: 0.10.0
libtpu: 0.0.40
codegen_flags: <defaults>
</compile_context>

<pallas_src>
import jax
import jax.numpy as jnp
from jax.experimental import pallas as pl
from jax.experimental.pallas import tpu as pltpu


# ----------------------------------------------------------------------------
# Pallas kernel: BinaryClassifier head
# ----------------------------------------------------------------------------
def _classifier_kernel(xT_ref, w1T_ref, b1_ref, w2_ref, b2_ref, out_ref):
    """fc1 -> ReLU -> fc2 -> sigmoid on a transposed (D, TB) activation tile.

    Processed in 128-lane column slabs (static unroll, static slices are free
    ref views) so only ~16 f32 vregs of the ReLU intermediate are live per
    slab even when TB = 512.
    """
    w1 = w1T_ref[...]                       # (H, D)  bf16, VMEM-resident
    b1 = b1_ref[...]                        # (H, 1)  f32
    w2 = w2_ref[...]                        # (H, 1)  f32
    b2 = b2_ref[0, 0]                       # scalar bias from SMEM

    tb = xT_ref.shape[1]
    for j in range(tb // 128):              # static unroll over lane slabs
        lo, hi = j * 128, (j + 1) * 128
        # fc1 on the MXU: (H, D) @ (D, 128) -> (H, 128), f32 accumulation.
        h = jnp.dot(w1, xT_ref[:, lo:hi], preferred_element_type=jnp.float32)
        h = jnp.maximum(h + b1, 0.0)        # bias + ReLU on the VPU
        # fc2 (output width 1): VPU multiply + cross-sublane (XLU) reduce.
        y = jnp.sum(h * w2, axis=0, keepdims=True) + b2        # (1, 128)
        # sigmoid with exact reciprocal (EUP exp; division has ample slack).
        out_ref[:, lo:hi] = (1.0 / (1.0 + jnp.exp(-y))).astype(out_ref.dtype)


def _round_up(n, m):
    return ((n + m - 1) // m) * m


def _choose_batch_tile(batch, max_tile=512):
    """Lane-width (multiple of 128) of one grid step for the classifier head.

    Big tiles amortize the ~0.35 us per-step pipeline overhead, but we keep
    >= 2 grid steps when there is enough work so the 'parallel' batch axis can
    be sharded across v7x's two TensorCores.
    """
    slabs = _round_up(max(batch, 1), 128) // 128
    if slabs <= 1:
        return 128
    max_slabs = max(1, max_tile // 128)
    tile_slabs = min(max_slabs, -(-slabs // 2))     # ceil(slabs / 2) -> grid >= 2
    return tile_slabs * 128


def binary_classifier_forward(x, w1, b1, w2, b2, *, max_batch_tile=512,
                              mxu_dtype=jnp.bfloat16, use_pallas=None):
    """x: (B, D); w1: (D, H); b1: (H,); w2: (H, 1); b2: (1,) -> (B, 1) float32."""
    B, D = x.shape
    H = w1.shape[1]

    if use_pallas is None:
        use_pallas = B >= 128
    if not use_pallas:
        # Small-batch fast path: fused XLA ops beat the Pallas launch +
        # pad/transpose overhead when < 128 lanes would do useful work.
        # (fc1 in bf16 to keep the same numerics as the Pallas path.)
        h = jnp.dot(x.astype(mxu_dtype), w1.astype(mxu_dtype),
                    preferred_element_type=jnp.float32)
        h = jnp.maximum(h + b1, 0.0)
        return jax.nn.sigmoid(jnp.dot(h, w2) + b2)

    H_pad = _round_up(H, 8)               # 128 for EEGSNet (already aligned)
    TB = _choose_batch_tile(B, max_batch_tile)
    B_pad = _round_up(B, TB)

    # Transposed operands, built directly in their kernel dtypes (no f32
    # (D, B_pad) intermediate).  D = 64 stays UNPADDED: as the full-array
    # sublane extent of xT / lane extent of w1T it satisfies the block rule
    # and halves the streamed bytes vs. padding K to 128.
    if B_pad == B:
        xT = x.T.astype(mxu_dtype)
    else:
        xT = jnp.zeros((D, B_pad), mxu_dtype).at[:, :B].set(x.T.astype(mxu_dtype))
    if H_pad == H:
        w1T = w1.T.astype(mxu_dtype)
        b1c = b1.astype(jnp.float32).reshape(H, 1)
        w2c = w2.astype(jnp.float32).reshape(H, 1)
    else:
        w1T = jnp.zeros((H_pad, D), mxu_dtype).at[:H, :].set(w1.T.astype(mxu_dtype))
        b1c = jnp.zeros((H_pad, 1), jnp.float32).at[:H, 0].set(b1)
        w2c = jnp.zeros((H_pad, 1), jnp.float32).at[:H, :].set(w2)
    b2s = jnp.asarray(b2, jnp.float32).reshape(1, 1)

    grid = (B_pad // TB,)
    # Per-step VMEM working set is well under 1 MiB, so no vmem_limit_bytes
    # override is needed even on v7x (64 MiB / TC).
    out = pl.pallas_call(
        _classifier_kernel,
        out_shape=jax.ShapeDtypeStruct((1, B_pad), jnp.float32),
        grid=grid,
        in_specs=[
            pl.BlockSpec((D, TB), lambda i: (0, i)),            # x tiles: streamed
            pl.BlockSpec((H_pad, D), lambda i: (0, 0)),         # w1: VMEM-resident
            pl.BlockSpec((H_pad, 1), lambda i: (0, 0)),         # b1: resident
            pl.BlockSpec((H_pad, 1), lambda i: (0, 0)),         # w2: resident
            pl.BlockSpec(memory_space=pltpu.MemorySpace.SMEM),  # b2: SMEM scalar
        ],
        out_specs=pl.BlockSpec((1, TB), lambda i: (0, i)),      # lane-dense output
        compiler_params=pltpu.CompilerParams(
            dimension_semantics=("parallel",)),
    )(xT, w1T, b1c, w2c, b2s)

    return out[0, :B].reshape(B, 1)


# ----------------------------------------------------------------------------
# SleepStageCNN feature extractor (plain JAX / XLA, eval mode, NHWC layout)
# ----------------------------------------------------------------------------
def _conv2d(x, w_hwio, b):
    y = jax.lax.conv_general_dilated(
        x, w_hwio, window_strides=(1, 1), padding=[(1, 1), (1, 1)],
        dimension_numbers=("NHWC", "HWIO", "NHWC"))
    return y + b[None, None, None, :]


def _max_pool2(x):
    return jax.lax.reduce_window(
        x, -jnp.inf, jax.lax.max, (1, 2, 2, 1), (1, 2, 2, 1), "VALID")


def _avg_pool2(x):
    s = jax.lax.reduce_window(
        x, 0.0, jax.lax.add, (1, 2, 2, 1), (1, 2, 2, 1), "VALID")
    return s * 0.25


def _batchnorm_eval(x, p, eps=1e-5):
    scale = p["gamma"] * jax.lax.rsqrt(p["var"] + eps)
    shift = p["beta"] - p["mean"] * scale
    return x * scale + shift                 # broadcast over channel (last) dim


def _gelu(x):
    return jax.nn.gelu(x, approximate=False)   # PyTorch nn.GELU default (erf)


def _conv_block(x, p, pool_type):
    x = _gelu(_conv2d(x, p["w1"], p["b1"]))
    x = _gelu(_conv2d(x, p["w2"], p["b2"]))
    x = _gelu(_conv2d(x, p["w3"], p["b3"]))
    x = _max_pool2(x) if pool_type == "max" else _avg_pool2(x)
    x = _batchnorm_eval(x, p["bn"])
    # Dropout: eval-mode identity.
    return x


def _nearest_resize(x, out_h, out_w):
    # F.interpolate(mode='nearest'): src_idx = floor(dst_idx * in / out).
    in_h, in_w = x.shape[1], x.shape[2]
    if in_h == 2 * out_h and in_w == 2 * out_w:
        return x[:, ::2, ::2, :]             # exact 2x downsample: strided slice
    rows = (jnp.arange(out_h) * in_h) // out_h
    cols = (jnp.arange(out_w) * in_w) // out_w
    return jnp.take(jnp.take(x, rows, axis=1), cols, axis=2)


def sleep_stage_cnn_forward(x_nchw, params):
    x = jnp.transpose(x_nchw, (0, 2, 3, 1))       # one layout change: NCHW -> NHWC
    x = _conv_block(x, params["block1"], "max")
    id1 = x
    x = _conv_block(x, params["block2"], "avg")
    x = x + _nearest_resize(id1, x.shape[1], x.shape[2])
    x = _conv_block(x, params["block3"], "max")
    id2 = x
    x = _conv_block(x, params["block4"], "avg")
    x = x + _nearest_resize(id2, x.shape[1], x.shape[2])
    x = _conv_block(x, params["block5"], "max")
    return jnp.mean(x, axis=(1, 2))               # AdaptiveAvgPool2d((1,1)) + flatten


def eegsnet_forward(x, params, *, use_pallas_head=None):
    feats = sleep_stage_cnn_forward(x, params["cnn"])        # (B, 64)
    c = params["classifier"]
    return binary_classifier_forward(feats, c["w1"], c["b1"], c["w2"], c["b2"],
                                     use_pallas=use_pallas_head)


# ----------------------------------------------------------------------------
# Parameter init (deterministic, eval-mode BN stats)
# ----------------------------------------------------------------------------
def _init_conv_block(key, c_in, c_out):
    ks = jax.random.split(key, 3)

    def conv_w(k, ci, co):
        std = (2.0 / (ci * 9)) ** 0.5
        # HWIO layout for NHWC convs; PyTorch OIHW converts via transpose(2,3,1,0).
        return jax.random.normal(k, (3, 3, ci, co), jnp.float32) * std

    return {
        "w1": conv_w(ks[0], c_in, c_out), "b1": jnp.zeros((c_out,), jnp.float32),
        "w2": conv_w(ks[1], c_out, c_out), "b2": jnp.zeros((c_out,), jnp.float32),
        "w3": conv_w(ks[2], c_out, c_out), "b3": jnp.zeros((c_out,), jnp.float32),
        "bn": {"gamma": jnp.ones((c_out,), jnp.float32),
               "beta": jnp.zeros((c_out,), jnp.float32),
               "mean": jnp.zeros((c_out,), jnp.float32),
               "var": jnp.ones((c_out,), jnp.float32)},
    }


def init_eegsnet_params(key):
    kb = jax.random.split(key, 6)
    cnn = {
        "block1": _init_conv_block(kb[0], 4, 32),
        "block2": _init_conv_block(kb[1], 32, 32),
        "block3": _init_conv_block(kb[2], 32, 64),
        "block4": _init_conv_block(kb[3], 64, 64),
        "block5": _init_conv_block(kb[4], 64, 64),
    }
    d, h = 64, 128                                  # EEGSNet classifier dims
    k1, k2, k3, k4 = jax.random.split(kb[5], 4)
    lim1 = 1.0 / (d ** 0.5)
    lim2 = 1.0 / (h ** 0.5)
    classifier = {
        "w1": jax.random.uniform(k1, (d, h), jnp.float32, -lim1, lim1),
        "b1": jax.random.uniform(k2, (h,), jnp.float32, -lim1, lim1),
        "w2": jax.random.uniform(k3, (h, 1), jnp.float32, -lim2, lim2),
        "b2": jax.random.uniform(k4, (1,), jnp.float32, -lim2, lim2),
    }
    return {"cnn": cnn, "classifier": classifier}


if __name__ == "__main__":
    key = jax.random.PRNGKey(0)
    kx, kp = jax.random.split(key)

    # EEGSNet input: (batch, 4 EEG channels, 32, 32) — spatial must be >= 32
    # to survive five 2x2 pools (spatial becomes 1x1 before GAP).
    x = jax.random.normal(kx, (2, 4, 32, 32), jnp.float32)
    params = init_eegsnet_params(kp)

    # End-to-end forward; force the Pallas head so the kernel runs even at
    # B=2 (production auto-path would take the fused-XLA head for B < 128).
    out = jax.block_until_ready(eegsnet_forward(x, params, use_pallas_head=True))
    assert out.shape == (2, 1)

    # Reference for the Pallas classifier head: same CNN features, same bf16
    # quantization of the fc1 operands, otherwise full-f32 math.
    feats = sleep_stage_cnn_forward(x, params["cnn"])
    c = params["classifier"]

    def head_ref(f):
        fq = f.astype(jnp.bfloat16).astype(jnp.float32)
        wq = c["w1"].astype(jnp.bfloat16).astype(jnp.float32)
        h = jnp.maximum(
            jnp.dot(fq, wq, precision=jax.lax.Precision.HIGHEST) + c["b1"], 0.0)
        return jax.nn.sigmoid(
            jnp.dot(h, c["w2"], precision=jax.lax.Precision.HIGHEST) + c["b2"])

    ref = head_ref(feats)
    assert jnp.allclose(out, ref, atol=2e-3, rtol=0.0), \
        float(jnp.max(jnp.abs(out - ref)))

    # Exercise the multi-tile / multi-slab Pallas path (TB=256 -> grid of 2
    # steps, 2 lane slabs per step) with a larger synthetic feature batch.
    feats_big = jax.random.normal(jax.random.PRNGKey(1), (260, 64), jnp.float32)
    out_big = jax.block_until_ready(
        binary_classifier_forward(feats_big, c["w1"], c["b1"], c["w2"], c["b2"]))
    ref_big = head_ref(feats_big)
    assert out_big.shape == (260, 1)
    assert jnp.allclose(out_big, ref_big, atol=2e-3, rtol=0.0), \
        float(jnp.max(jnp.abs(out_big - ref_big)))

    print("KERNEL_OK")
</pallas_src>

<mosaic_0001>
module attributes {stable_mosaic.version = 11 : i64} {
  func.func @_classifier_kernel(%arg0: i32, %arg1: memref<64x128xbf16, #tpu.memory_space<vmem>>, %arg2: memref<128x64xbf16, #tpu.memory_space<vmem>>, %arg3: memref<128x1xf32, #tpu.memory_space<vmem>>, %arg4: memref<128x1xf32, #tpu.memory_space<vmem>>, %arg5: memref<1x1xf32, #tpu.memory_space<smem>>, %arg6: memref<1x128xf32, #tpu.memory_space<vmem>>) attributes {dimension_semantics = [#tpu.dimension_semantics<parallel>], iteration_bounds = array<i64: 1>, scalar_prefetch = 0 : i64, scratch_operands = 0 : i64, tpu.core_type = #tpu.core_type<tc>, window_params = [{transform_indices = @transform_0, window_bounds = array<i64: 64, 128>}, {pipeline_mode = #tpu.pipeline_mode<synchronous>, transform_indices = @transform_1, window_bounds = array<i64: 128, 64>}, {pipeline_mode = #tpu.pipeline_mode<synchronous>, transform_indices = @transform_2, window_bounds = array<i64: 128, 1>}, {pipeline_mode = #tpu.pipeline_mode<synchronous>, transform_indices = @transform_3, window_bounds = array<i64: 128, 1>}, {transform_indices = @transform_4, window_bounds = array<i64: 1, 1>}, {transform_indices = @transform_5, window_bounds = array<i64: 1, 128>}]} {
    %c0 = arith.constant 0 : index
    %c0_0 = arith.constant 0 : index
    %0 = vector.load %arg2[%c0, %c0_0] : memref<128x64xbf16, #tpu.memory_space<vmem>>, vector<128x64xbf16>
    %c0_1 = arith.constant 0 : index
    %c0_2 = arith.constant 0 : index
    %1 = vector.load %arg3[%c0_1, %c0_2] : memref<128x1xf32, #tpu.memory_space<vmem>>, vector<128x1xf32>
    %c0_3 = arith.constant 0 : index
    %c0_4 = arith.constant 0 : index
    %2 = vector.load %arg4[%c0_3, %c0_4] : memref<128x1xf32, #tpu.memory_space<vmem>>, vector<128x1xf32>
    %c0_5 = arith.constant 0 : index
    %c0_6 = arith.constant 0 : index
    %3 = memref.load %arg5[%c0_5, %c0_6] : memref<1x1xf32, #tpu.memory_space<smem>>
    %c0_7 = arith.constant 0 : index
    %c0_8 = arith.constant 0 : index
    %4 = vector.load %arg1[%c0_7, %c0_8] : memref<64x128xbf16, #tpu.memory_space<vmem>>, vector<64x128xbf16>
    %cst = arith.constant dense<0.000000e+00> : vector<128x128xf32>
    %5 = tpu.matmul %0, %4, %cst {dimension_numbers = #tpu.dot_dimension_numbers<[1], [0], [0], [1], [0, 0, 1, 1], [], []>} : vector<128x64xbf16>, vector<64x128xbf16>, vector<128x128xf32> -> vector<128x128xf32>
    %6 = vector.broadcast %1 : vector<128x1xf32> to vector<128x128xf32>
    %7 = arith.addf %5, %6 : vector<128x128xf32>
    %cst_9 = arith.constant 0.000000e+00 : f32
    %8 = vector.broadcast %cst_9 : f32 to vector<128x128xf32>
    %9 = arith.maximumf %7, %8 : vector<128x128xf32>
    %10 = vector.broadcast %2 : vector<128x1xf32> to vector<128x128xf32>
    %11 = arith.mulf %9, %10 : vector<128x128xf32>
    %cst_10 = arith.constant dense<0.000000e+00> : vector<128xf32>
    %12 = vector.multi_reduction <add>, %11, %cst_10 [0] : vector<128x128xf32> to vector<128xf32>
    %13 = vector.shape_cast %12 : vector<128xf32> to vector<1x128xf32>
    %14 = vector.broadcast %3 : f32 to vector<1x128xf32>
    %15 = arith.addf %13, %14 : vector<1x128xf32>
    %cst_11 = arith.constant 0.000000e+00 : f32
    %16 = vector.broadcast %cst_11 : f32 to vector<1x128xf32>
    %17 = arith.subf %16, %15 : vector<1x128xf32>
    %18 = math.exp %17 : vector<1x128xf32>
    %cst_12 = arith.constant 1.000000e+00 : f32
    %19 = vector.broadcast %cst_12 : f32 to vector<1x128xf32>
    %20 = arith.addf %19, %18 : vector<1x128xf32>
    %cst_13 = arith.constant 1.000000e+00 : f32
    %21 = vector.broadcast %cst_13 : f32 to vector<1x128xf32>
    %22 = arith.divf %21, %20 : vector<1x128xf32>
    %c0_14 = arith.constant 0 : index
    %c0_15 = arith.constant 0 : index
    %23 = vector.load %arg6[%c0_14, %c0_15] : memref<1x128xf32, #tpu.memory_space<vmem>>, vector<1x128xf32>
    tpu.vector_store %arg6[%c0_14, %c0_15], %22 {strides = array<i32>} : memref<1x128xf32, #tpu.memory_space<vmem>>, vector<1x128xf32>,
    return
  }
  func.func @transform_0(%arg0: i32) -> (i32, i32) {
    %c0_i32 = arith.constant 0 : i32
    %c0_i32_0 = arith.constant 0 : i32
    return %c0_i32, %arg0 : i32, i32
  }
  func.func @transform_1(%arg0: i32) -> (i32, i32) {
    %c0_i32 = arith.constant 0 : i32
    %c0_i32_0 = arith.constant 0 : i32
    %c0_i32_1 = arith.constant 0 : i32
    return %c0_i32, %c0_i32_0 : i32, i32
  }
  func.func @transform_2(%arg0: i32) -> (i32, i32) {
    %c0_i32 = arith.constant 0 : i32
    %c0_i32_0 = arith.constant 0 : i32
    %c0_i32_1 = arith.constant 0 : i32
    return %c0_i32, %c0_i32_0 : i32, i32
  }
  func.func @transform_3(%arg0: i32) -> (i32, i32) {
    %c0_i32 = arith.constant 0 : i32
    %c0_i32_0 = arith.constant 0 : i32
    %c0_i32_1 = arith.constant 0 : i32
    return %c0_i32, %c0_i32_0 : i32, i32
  }
  func.func @transform_4(%arg0: i32) -> (i32, i32) {
    %c0_i32 = arith.constant 0 : i32
    %c0_i32_0 = arith.constant 0 : i32
    %c0_i32_1 = arith.constant 0 : i32
    return %c0_i32, %c0_i32_0 : i32, i32
  }
  func.func @transform_5(%arg0: i32) -> (i32, i32) {
    %c0_i32 = arith.constant 0 : i32
    %c0_i32_0 = arith.constant 0 : i32
    return %c0_i32, %arg0 : i32, i32
  }
}

</mosaic_0001>

<bundles_post_ra>
// kernel: tpu_custom_call.1
= control target key start
LH: loop header
LB: loop body
LE: loop exit
PB: predicated region body
PF: predicated region fallthrough
CT: control target
= control target key end

     0   :  { %v610_v2 = vmov 0   ;;  %vm224_vm0 = vcmask 523264   ;;  %s800_s0 = inlined_call_operand.vmem [shape: bf16[64,128], index: 0, kind: input, shape index: {}]   ;;  %s801_s1 = inlined_call_operand.vmem [shape: bf16[128,64], index: 1, kind: input, shape index: {}]   ;;  %s802_s2 = inlined_call_operand.vmem [shape: f32[128,1], index: 2, kind: input, shape index: {}]   ;;  %s803_s3 = inlined_call_operand.vmem [shape: f32[128,1], index: 3, kind: input, shape index: {}]   ;;  %s804_s4 = inlined_call_operand.<no memory space> [shape: f32[1,1], index: 4, kind: input, shape index: {}]   ;;  %s805_s5 = inlined_call_operand.hbm [shape: f32[1,128], index: 5, kind: output, shape index: {}]  }
   0x1   :  { %v570_v0 = vld [vmem:[%s800_s0] sm:$0xff]   ;;  %v571_v1 = vld [vmem:[%s800_s0 + $0x8] sm:$0xff]   ;;  %568 = vset.pattern.permute.xlu0 %v610_v2  ;;  %569 = vset.pattern.permute.xlu1 %v610_v2  ;;  %v572_v3 = vld [vmem:[%s800_s0 + $0x10] sm:$0xff]  }
   0x2   :  { %534 = vmatprep.subr.bf16.mxu0 %v570_v0  ;;  %558 = vmatprep.subr.bf16.mxu1 %v570_v0  ;;  %v39_v4 = vld [vmem:[%s802_s2] sm:$0xff]  ;;  %v41_v5 = vld [vmem:[%s802_s2 + $0x10] sm:$0xff]  ;;  %v573_v8 = vld [vmem:[%s800_s0 + $0x18] sm:$0xff]  }
   0x3   :  { %535 = vmatpush3.bf16.msra.mxu0 %v570_v0  ;;  %562 = vmatpush3.bf16.msra.mxu1 %v570_v0  ;;  %v574_v6 = vld [vmem:[%s801_s1] sm:$0xff]   ;;  %v40_v9 = vld [vmem:[%s802_s2 + $0x8] sm:$0xff]  ;;  %v42_v10 = vld [vmem:[%s802_s2 + $0x18] sm:$0xff] }
   0x4   :  { %536 = vmatprep.subr.bf16.mxu0 %v571_v1  ;;  %559 = vmatprep.subr.bf16.mxu1 %v571_v1  ;;  %v575_v7 = vld [vmem:[%s801_s1 + $0x20] sm:$0xff]   ;;  %v56_v12 = vld [vmem:[%s803_s3 + $0x8] sm:$0xff]  ;;  %v578_v15 = vld [vmem:[%s801_s1 + $0x10] sm:$0xff]  }
   0x5   :  { %82 = vperm.xlu0 %568, %v39_v4   ;;  %92 = vperm.xlu1 %569, %v41_v5   ;;  %v55_v11 = vld [vmem:[%s803_s3] sm:$0xff]  ;;  %v576_v13 = vld [vmem:[%s801_s1 + $0x8] sm:$0xff]   ;;  %v579_v16 = vld [vmem:[%s801_s1 + $0x30] sm:$0xff]  }
   0x6   :  { %542 = vmatprep.mubr.msk.bf16.mxu0 %vm224_vm0, %v574_v6  ;;  %550 = vmatprep.mubr.msk.bf16.mxu1 %vm224_vm0, %v575_v7  ;;  %v577_v14 = vld [vmem:[%s801_s1 + $0x28] sm:$0xff]   ;;  %v43_v17 = vld [vmem:[%s802_s2 + $0x20] sm:$0xff]  ;;  %v57_v18 = vld [vmem:[%s803_s3 + $0x10] sm:$0xff] }
   0x7   :  { %537 = vmatpush3.bf16.msra.mxu0 %v571_v1  ;;  %563 = vmatpush3.bf16.msra.mxu1 %v571_v1  ;;  %v44_v19 = vld [vmem:[%s802_s2 + $0x28] sm:$0xff]  ;;  %v58_v20 = vld [vmem:[%s803_s3 + $0x18] sm:$0xff] }
   0x8   :  { %538 = vmatprep.subr.bf16.mxu0 %v572_v3  ;;  %560 = vmatprep.subr.bf16.mxu1 %v572_v3  ;;  %v580_v21 = vld [vmem:[%s801_s1 + $0x18] sm:$0xff]  }
   0x9   :  { %87 = vperm.xlu0 %568, %v40_v9   ;;  %97 = vperm.xlu1 %569, %v42_v10   ;;  %v581_v22 = vld [vmem:[%s801_s1 + $0x38] sm:$0xff]  }
   0xb   :  { %539 = vmatpush3.bf16.msra.mxu0 %v572_v3  ;;  %564 = vmatpush3.bf16.msra.mxu1 %v572_v3 }
   0xc   :  { %540 = vmatprep.subr.bf16.mxu0 %v573_v8  ;;  %561 = vmatprep.subr.bf16.mxu1 %v573_v8 }
   0xd   :  { %364 = vperm.xlu0 %568, %v55_v11   ;;  %369 = vperm.xlu1 %569, %v56_v12  }
   0xf   :  { %541 = vmatpush3.bf16.msra.mxu0 %v573_v8  ;;  %565 = vmatpush3.bf16.msra.mxu1 %v573_v8 }
  0x11   :  { %102 = vperm.xlu0 %568, %v43_v17   ;;  %374 = vperm.xlu1 %569, %v57_v18  }
  0x12   :  { %543 = vmatmul.mubr.msk.bf16.vlgmr.msra.gmra.mrb[0].mxu0 %vm224_vm0, %v576_v13  ;;  %551 = vmatmul.mubr.msk.bf16.vlgmr.msra.gmra.mrb[0].mxu1 %vm224_vm0, %v577_v14 }
  0x13   :  { %546 = vmatprep.mubr.msk.bf16.mxu0 %vm224_vm0, %v578_v15  ;;  %554 = vmatprep.mubr.msk.bf16.mxu1 %vm224_vm0, %v579_v16 }
  0x14   :  { %11 = vsyncpa [#allocation4], 0  ;;  %v45_v23 = vld [vmem:[%s802_s2 + $0x30] sm:$0xff]  ;;  %v59_v24 = vld [vmem:[%s803_s3 + $0x20] sm:$0xff]  ;;  %s611_s26 = smov [#allocation3]  }
  0x15   :  { %107 = vperm.xlu0 %568, %v44_v19   ;;  %379 = vperm.xlu1 %569, %v58_v20   ;;  %v46_v25 = vld [vmem:[%s802_s2 + $0x38] sm:$0xff]  ;;  %v60_v26 = vld [vmem:[%s803_s3 + $0x28] sm:$0xff]  ;;  %v47_v27 = vld [vmem:[%s802_s2 + $0x40] sm:$0xff]  ;;  %s494_s27 = sshll.u32 %s611_s26, 4  ;;  %s495_s27 = int_to_ptr.vmem [resolvable:$true] %s494_s27 }
  0x16   :  { %v61_v28 = vld [vmem:[%s803_s3 + $0x30] sm:$0xff]  ;;  %v48_v29 = vld [vmem:[%s802_s2 + $0x48] sm:$0xff]  ;;  %v62_v30 = vld [vmem:[%s803_s3 + $0x38] sm:$0xff]  ;;  %s586_s28 = scalar_lea.vmem %s495_s27, 16  ;;  %s590_s29 = scalar_lea.vmem %s495_s27, 32 }
  0x17   :  { %v49_v31 = vld [vmem:[%s802_s2 + $0x50] sm:$0xff]  ;;  %v63_v32 = vld [vmem:[%s803_s3 + $0x40] sm:$0xff]  ;;  %v50_v33 = vld [vmem:[%s802_s2 + $0x58] sm:$0xff]  ;;  %p587_p0 = scmp.ne.s32.totalorder %s495_s27, %s586_s28  ;;  %p591_p1 = scmp.lt.s32.totalorder %s495_s27, %s495_s27 }
  0x18   :  { %v64_v34 = vld [vmem:[%s803_s3 + $0x48] sm:$0xff]  ;;  %v51_v35 = vld [vmem:[%s802_s2 + $0x60] sm:$0xff]  ;;  %v65_v36 = vld [vmem:[%s803_s3 + $0x50] sm:$0xff]  ;;  %p592_p2 = scmp.lt.s32.totalorder %s590_s29, %s586_s28 }
  0x19   :  { %112 = vperm.xlu0 %568, %v45_v23   ;;  %384 = vperm.xlu1 %569, %v59_v24   ;;  %v52_v37 = vld [vmem:[%s802_s2 + $0x68] sm:$0xff]  ;;  %v66_v38 = vld [vmem:[%s803_s3 + $0x58] sm:$0xff]  ;;  %v53_v39 = vld [vmem:[%s802_s2 + $0x70] sm:$0xff] }
  0x1a   :  { %547 = vmatmul.mubr.msk.bf16.gmra.mrb[4].mxu0 %vm224_vm0, %v580_v21  ;;  %555 = vmatmul.mubr.msk.bf16.gmra.mrb[4].mxu1 %vm224_vm0, %v581_v22  ;;  %v67_v40 = vld [vmem:[%s803_s3 + $0x60] sm:$0xff]  ;;  %v54_v41 = vld [vmem:[%s802_s2 + $0x78] sm:$0xff]  ;;  %v68_v42 = vld [vmem:[%s803_s3 + $0x68] sm:$0xff]  ;;  %p593_p3 = por %p592_p2, %p591_p1 }
  0x1b   :  { %v69_v43 = vld [vmem:[%s803_s3 + $0x70] sm:$0xff]  ;;  %v70_v44 = vld [vmem:[%s803_s3 + $0x78] sm:$0xff] }
  0x1c   :  { %p594_p4 = pnand %p593_p3, %p587_p0 }
  0x1d   :  { %117 = vperm.xlu0 %568, %v46_v25   ;;  %389 = vperm.xlu1 %569, %v60_v26  }
  0x21   :  { %122 = vperm.xlu0 %568, %v47_v27   ;;  %394 = vperm.xlu1 %569, %v61_v28  }
  0x25   :  { %127 = vperm.xlu0 %568, %v48_v29   ;;  %399 = vperm.xlu1 %569, %v62_v30  }
  0x29   :  { %132 = vperm.xlu0 %568, %v49_v31   ;;  %404 = vperm.xlu1 %569, %v63_v32  }
  0x2d   :  { %137 = vperm.xlu0 %568, %v50_v33   ;;  %409 = vperm.xlu1 %569, %v64_v34  }
  0x31   :  { %142 = vperm.xlu0 %568, %v51_v35   ;;  %414 = vperm.xlu1 %569, %v65_v36  }
  0x35   :  { %147 = vperm.xlu0 %568, %v52_v37   ;;  %419 = vperm.xlu1 %569, %v66_v38  }
  0x39   :  { %152 = vperm.xlu0 %568, %v53_v39   ;;  %424 = vperm.xlu1 %569, %v67_v40  }
  0x3d   :  { %157 = vperm.xlu0 %568, %v54_v41   ;;  %429 = vperm.xlu1 %569, %v68_v42  }
  0x41   :  { %434 = vperm.xlu0 %568, %v69_v43   ;;  %439 = vperm.xlu1 %569, %v70_v44  }
  0x84   :  { %v83_v45 = vpop.permute.xlu0 %82  ;;  %v93_v46 = vpop.permute.xlu1 %92 }
  0x88   :  { %v88_v47 = vpop.permute.xlu0 %87  ;;  %v98_v48 = vpop.permute.xlu1 %97 }
  0x8c   :  { %v365_v49 = vpop.permute.xlu0 %364  ;;  %v370_v50 = vpop.permute.xlu1 %369 }
  0x90   :  { %v103_v51 = vpop.permute.xlu0 %102  ;;  %v375_v52 = vpop.permute.xlu1 %374 }
  0x94   :  { %v108_v53 = vpop.permute.xlu0 %107  ;;  %v380_v54 = vpop.permute.xlu1 %379 }
  0x98   :  { %v113_v55 = vpop.permute.xlu0 %112  ;;  %v385_v56 = vpop.permute.xlu1 %384 }
  0x9c   :  { %v118_v57 = vpop.permute.xlu0 %117  ;;  %v390_v58 = vpop.permute.xlu1 %389 }
  0xa0   :  { %v123_v59 = vpop.permute.xlu0 %122  ;;  %v395_v60 = vpop.permute.xlu1 %394 }
  0xa4   :  { %v128_v61 = vpop.permute.xlu0 %127  ;;  %v400_v62 = vpop.permute.xlu1 %399 }
  0xa8   :  { %v133_v63 = vpop.permute.xlu0 %132  ;;  %v405_v0 = vpop.permute.xlu1 %404 }
  0xac   :  { %v138_v1 = vpop.permute.xlu0 %137  ;;  %v782_v2 = vpop.permute.xlu1 %409 }
  0xb0   :  { %v143_v18 = vpop.permute.xlu0 %142  ;;  %v415_v19 = vpop.permute.xlu1 %414 }
  0xe5   :  { %v544_v3 = vpop.f32.mrb[0].mxu0  ;;  %v552_v4 = vpop.f32.mrb[0].mxu1 }
  0xe6   :  { %v283_v5 = vpop.f32.mrb[1].mxu0  ;;  %v315_v6 = vpop.f32.mrb[1].mxu1  ;;  %v292_v7 = vadd.f32 %v544_v3, %v93_v46 }
  0xe7   :  { %v284_v8 = vadd.f32 %v283_v5, %v83_v45  ;;  %v545_v9 = vpop.f32.mrb[2].mxu0  ;;  %v553_v10 = vpop.f32.mrb[2].mxu1  ;;  %v316_v40 = vadd.f32 %v315_v6, %v123_v59 }
  0xe8   :  { %v295_v11 = vadd.f32 %v545_v9, %v98_v48  ;;  %v286_v12 = vpop.f32.mrb[3].mxu0  ;;  %v318_v13 = vpop.f32.mrb[3].mxu1  ;;  %v348_v16 = vmax.f32 %v292_v7, 0.0  ;;  %v327_v3 = vadd.f32 %v553_v10, %v138_v1 }
  0xe9   :  { %v346_v14 = vmax.f32 %v284_v8, 0.0  ;;  %v287_v15 = vadd.f32 %v286_v12, %v88_v47  ;;  %v148_v45 = vpop.permute.xlu0 %147  ;;  %v319_v46 = vadd.f32 %v318_v13, %v128_v61 }
  0xea   :  { %v349_v20 = vmax.f32 %v295_v11, 0.0  ;;  %v444_v27 = vmul.f32 %v375_v52, %v348_v16  ;;  %v354_v52 = vmax.f32 %v316_v40, 0.0  ;;  %v357_v11 = vmax.f32 %v327_v3, 0.0 }
  0xeb   :  { %v347_v17 = vmax.f32 %v287_v15, 0.0  ;;  %v442_v21 = vmul.f32 %v365_v49, %v346_v14  ;;  %v355_v5 = vmax.f32 %v319_v46, 0.0 }
  0xec   :  { %v445_v33 = vmul.f32 %v380_v54, %v349_v20  ;;  %v450_v6 = vmul.f32 %v405_v0, %v354_v52 }
  0xed   :  { %v443_v22 = vmul.f32 %v370_v50, %v347_v17  ;;  %v548_v23 = vpop.f32.mrb[4].mxu0  ;;  %v556_v24 = vpop.f32.mrb[4].mxu1  ;;  %v451_v61 = vmul.f32 %v782_v2, %v355_v5 }
  0xee   :  { %v299_v25 = vpop.f32.mrb[5].mxu0  ;;  %v331_v26 = vpop.f32.mrb[5].mxu1  ;;  %v308_v29 = vadd.f32 %v548_v23, %v113_v55 }
  0xef   :  { %v458_v28 = vadd.f32 %v443_v22, %v442_v21  ;;  %v300_v30 = vadd.f32 %v299_v25, %v103_v51  ;;  %v549_v31 = vpop.f32.mrb[6].mxu0  ;;  %v557_v32 = vpop.f32.mrb[6].mxu1  ;;  %v324_v51 = vadd.f32 %v552_v4, %v133_v63 }
  0xf0   :  { %v302_v34 = vpop.f32.mrb[7].mxu0  ;;  %v334_v35 = vpop.f32.mrb[7].mxu1  ;;  %v311_v38 = vadd.f32 %v549_v31, %v118_v57  ;;  %v352_v41 = vmax.f32 %v308_v29, 0.0 }
  0xf1   :  { %v459_v36 = vadd.f32 %v458_v28, %v444_v27  ;;  %v350_v37 = vmax.f32 %v300_v30, 0.0  ;;  %v303_v39 = vadd.f32 %v302_v34, %v108_v53  ;;  %v420_v50 = vpop.permute.xlu1 %419  ;;  %v153_v53 = vpop.permute.xlu0 %152  ;;  %v356_v59 = vmax.f32 %v324_v51, 0.0 }
  0xf2   :  { %v353_v48 = vmax.f32 %v311_v38, 0.0  ;;  %v448_v54 = vmul.f32 %v395_v60, %v352_v41  ;;  %v340_v63 = vadd.f32 %v556_v24, %v153_v53  ;;  %v453_v1 = vmul.f32 %v420_v50, %v357_v11 }
  0xf3   :  { %v446_v42 = vmul.f32 %v385_v56, %v350_v37  ;;  %v460_v43 = vadd.f32 %v459_v36, %v445_v33  ;;  %v351_v44 = vmax.f32 %v303_v39, 0.0  ;;  %v332_v56 = vadd.f32 %v331_v26, %v143_v18 }
  0xf4   :  { %v449_v7 = vmul.f32 %v400_v62, %v353_v48  ;;  %v452_v13 = vmul.f32 %v415_v19, %v356_v59  ;;  %v360_v17 = vmax.f32 %v340_v63, 0.0  ;;  %v479_v33 = vstv %s804_s4 }
  0xf5   :  { %v461_v47 = vadd.f32 %v460_v43, %v446_v42  ;;  %v447_v49 = vmul.f32 %v390_v58, %v351_v44  ;;  %v425_v9 = vpop.permute.xlu1 %424  ;;  %v335_v58 = vadd.f32 %v334_v35, %v148_v45  ;;  %v358_v4 = vmax.f32 %v332_v56, 0.0  ;;  %v158_v14 = vpop.permute.xlu0 %157 }
  0xf6   :  { %v343_v10 = vadd.f32 %v557_v32, %v158_v14 }
  0xf7   :  { %v462_v55 = vadd.f32 %v461_v47, %v447_v49  ;;  %v359_v62 = vmax.f32 %v335_v58, 0.0  ;;  %v454_v0 = vmul.f32 %v425_v9, %v358_v4 }
  0xf8   :  { %v361_v20 = vmax.f32 %v343_v10, 0.0 }
  0xf9   :  { %v463_v57 = vadd.f32 %v462_v55, %v448_v54  ;;  %v430_v16 = vpop.permute.xlu1 %429  ;;  %v435_v23 = vpop.permute.xlu0 %434 }
  0xfa   :  { %v455_v21 = vmul.f32 %v430_v16, %v359_v62  ;;  %v456_v2 = vmul.f32 %v435_v23, %v360_v17 }
  0xfb   :  { %v464_v8 = vadd.f32 %v463_v57, %v449_v7 }
  0xfd   :  { %v465_v12 = vadd.f32 %v464_v8, %v450_v6  ;;  %v440_v26 = vpop.permute.xlu1 %439 }
  0xfe   :  { %v457_v19 = vmul.f32 %v440_v26, %v361_v20 }
  0xff   :  { %v466_v60 = vadd.f32 %v465_v12, %v451_v61 }
 0x101   :  { %v467_v15 = vadd.f32 %v466_v60, %v452_v13 }
 0x103   :  { %v468_v18 = vadd.f32 %v467_v15, %v453_v1 }
 0x105   :  { %v469_v22 = vadd.f32 %v468_v18, %v454_v0 }
 0x107   :  { %v470_v25 = vadd.f32 %v469_v22, %v455_v21 }
 0x109   :  { %v471_v24 = vadd.f32 %v470_v25, %v456_v2 }
 0x10b   :  { %v472_v27 = vadd.f32 %v471_v24, %v457_v19 }
 0x10d   :  { %v473_v28 = vrot.slane %v472_v27, 4 }
 0x10f   :  { %v474_v29 = vadd.f32 %v473_v28, %v472_v27 }
 0x111   :  { %v475_v30 = vrot.slane %v474_v29, 2 }
 0x113   :  { %v476_v31 = vadd.f32 %v475_v30, %v474_v29 }
 0x115   :  { %v477_v32 = vrot.slane %v476_v31, 1 }
 0x117   :  { %v478_v34 = vadd.f32 %v477_v32, %v476_v31 }
 0x119   :  { %v480_v35 = vadd.f32 %v479_v33, %v478_v34 }
 0x11b   :  { %v481_v36 = vsub.f32 0.0, %v480_v35 }
 0x11d   :  { %v482_v37 = vmul.f32 1.442695, %v481_v36 }
 0x11f   :  { %582 = vpow2.f32 %v482_v37 }
 0x129   :  { %v583_v38 = vpop.eup %582 }
 0x12a   :  { %v484_v39 = vadd.f32 1.0, %v583_v38 }
 0x12c   :  { %584 = vrcp.f32 %v484_v39 }
 0x136   :  { %v585_v40 = vpop.eup %584 }
 0x137   :  { %487 = vst [vmem:[#allocation3] sm:$0x1] %v585_v40 }
 0x138   :  { %597 = shalt.err (!%p594_p4)
}
 0x139   :  { %s598_s6 = scalar_lea.hbm %s805_s5, 16 }
 0x13a   :  { %p599_p5 = scmp.ne.s32.totalorder %s805_s5, %s598_s6  ;;  %p602_p6 = scmp.lt.u32.totalorder %s598_s6, %s805_s5 }
 0x13c   :  { %p604_p7 = pnand %p602_p6, %p599_p5 }
 0x13e   :  { %607 = shalt.err (!%p604_p7)
}
 0x13f   :  { %497 = dma.vmem_to_hbm [thread:$0]  %s495_s27, 16, %s805_s5, [#allocation4]  }
 0x140   :  { %608 = dma.done.wait [#allocation4], 16  }
 0x141   :  { %609 = vsyncadd [#allocation4], 4294967280 }
 0x142   :  { %501 = vsyncpa [#allocation4], 1 }

</bundles_post_ra>
